<compile_context>
chip_gen: v7x
topology: tpu7x:2x2x1
jax: 0.10.0
libtpu: 0.0.40
codegen_flags: <defaults>
</compile_context>

<pallas_src>
import math

import jax
import jax.numpy as jnp
from jax.experimental import pallas as pl
from jax.experimental.pallas import tpu as pltpu


def _round_up(x, m):
    return ((x + m - 1) // m) * m


def _cdiv(a, b):
    return -(-a // b)


def mlp_kernel(x_ref, w1_ref, b1_ref, w2_ref, b2_ref, o_ref):
    """out = (x @ W1t + b1) @ W2t + b2.

    W1t: [K, H], W2t: [H, C_pad] (pre-transposed, bf16, MXU-native layout).
    Both dots accumulate in f32; biases are added in f32; the intermediate is
    cast back to bf16 before the second dot so the MXU stays on its bf16 path.
    """
    h = jnp.dot(x_ref[...], w1_ref[...], preferred_element_type=jnp.float32)
    h = h + b1_ref[...]                      # (1, H) broadcasts over batch tile
    h = h.astype(w2_ref.dtype)               # back to bf16 for the second MXU pass
    out = jnp.dot(h, w2_ref[...], preferred_element_type=jnp.float32)
    out = out + b2_ref[...]
    # NOTE: if a K-reduction grid axis is ever added (very large K/H on v7x),
    # gate the bias adds with pl.when(k == pl.num_programs(-1) - 1) and zero an
    # f32 acc scratch at k == 0.
    o_ref[...] = out.astype(o_ref.dtype)


def prepare_params(w1, b1, w2, b2, *, param_dtype=jnp.bfloat16):
    """One-time parameter prep (do NOT call per forward).

    w1: [H, K], b1: [H], w2: [C, H], b2: [C]  (PyTorch Linear convention).
    Returns (w1t[K,H] bf16, b1[1,H] f32, w2t[H,C_pad] bf16, b2[1,C_pad] f32, C).
    """
    H, K = w1.shape
    C = w2.shape[0]
    C_pad = _round_up(max(C, 128), 128)

    w1t = jnp.asarray(w1, jnp.float32).T.astype(param_dtype)            # [K, H]
    w2t = jnp.zeros((H, C_pad), param_dtype)
    w2t = w2t.at[:, :C].set(jnp.asarray(w2, jnp.float32).T.astype(param_dtype))
    b1_2d = jnp.asarray(b1, jnp.float32).reshape(1, H)
    b2_2d = jnp.zeros((1, C_pad), jnp.float32).at[0, :C].set(
        jnp.asarray(b2, jnp.float32))
    return w1t, b1_2d, w2t, b2_2d, C


def _choose_tm(B, tm_cap=256):
    """Batch tile: <= tm_cap rows, multiple of 16 (bf16 sublane packing),
    sized so the grid divides B with at most one sublane-group of padding."""
    if B <= tm_cap:
        return _round_up(B, 16)
    n_steps = _cdiv(B, tm_cap)
    return _round_up(_cdiv(B, n_steps), 16)


def classification1_forward(x, w1t, b1_2d, w2t, b2_2d, num_classes, *, tm_cap=256):
    """x: [B, input_size].  Parameters are the outputs of prepare_params().
    Returns [B, num_classes] in float32."""
    B, K = x.shape
    H = w1t.shape[1]
    C_pad = w2t.shape[1]

    TM = _choose_tm(B, tm_cap)
    n_steps = _cdiv(B, TM)
    B_pad = TM * n_steps

    x_bf = x.astype(jnp.bfloat16)
    if B_pad != B:
        x_bf = jnp.pad(x_bf, ((0, B_pad - B), (0, 0)))

    out_dtype = jnp.float32

    # VMEM budget: resident weights/biases + double-buffered x/out tiles +
    # the live (TM, H) f32 intermediate, with ~50% headroom.
    weight_bytes = (K * H + H * C_pad) * 2 + (H + C_pad) * 4
    io_bytes = 2 * TM * (K * 2 + C_pad * 4)          # bf16 in tile, f32 out tile
    inter_bytes = TM * H * 4
    vmem_limit = int(1.5 * (weight_bytes + io_bytes + inter_bytes)) + (4 << 20)
    vmem_limit = max(vmem_limit, 16 << 20)
    vmem_limit = min(vmem_limit, 100 << 20)

    flops = 2 * B_pad * (K * H + H * C_pad)
    bytes_accessed = (B_pad * K * 2            # x (bf16)
                      + weight_bytes           # weights + biases
                      + B_pad * C_pad * 4)     # output (f32)

    out = pl.pallas_call(
        mlp_kernel,
        out_shape=jax.ShapeDtypeStruct((B_pad, C_pad), out_dtype),
        grid=(n_steps,),
        in_specs=[
            pl.BlockSpec((TM, K), lambda i: (i, 0)),       # x: tiled over batch
            pl.BlockSpec((K, H), lambda i: (0, 0)),        # w1t: VMEM-resident
            pl.BlockSpec((1, H), lambda i: (0, 0)),        # b1: VMEM-resident
            pl.BlockSpec((H, C_pad), lambda i: (0, 0)),    # w2t (padded): resident
            pl.BlockSpec((1, C_pad), lambda i: (0, 0)),    # b2 (padded): resident
        ],
        out_specs=pl.BlockSpec((TM, C_pad), lambda i: (i, 0)),
        compiler_params=pltpu.CompilerParams(
            dimension_semantics=("parallel",),             # batch axis shards across TCs
            vmem_limit_bytes=vmem_limit,
        ),
        cost_estimate=pl.CostEstimate(
            flops=flops, transcendentals=0, bytes_accessed=bytes_accessed),
    )(x_bf, w1t, b1_2d, w2t, b2_2d)

    # Slice back to the PyTorch module's output shape.  (If the consumer
    # tolerates the lane-dense padded buffer, return `out[:B]` instead to skip
    # the class-dim copy.)
    return out[:B, :num_classes]


def init_params(key, input_size, hidden_size, num_classes):
    # Deterministic init mimicking PyTorch Linear's U(-1/sqrt(fan_in), 1/sqrt(fan_in)).
    k1, k2, k3, k4 = jax.random.split(key, 4)
    bound1 = 1.0 / (input_size ** 0.5)
    bound2 = 1.0 / (hidden_size ** 0.5)
    w1 = jax.random.uniform(k1, (hidden_size, input_size), jnp.float32, -bound1, bound1)
    b1 = jax.random.uniform(k2, (hidden_size,), jnp.float32, -bound1, bound1)
    w2 = jax.random.uniform(k3, (num_classes, hidden_size), jnp.float32, -bound2, bound2)
    b2 = jax.random.uniform(k4, (num_classes,), jnp.float32, -bound2, bound2)
    return w1, b1, w2, b2


if __name__ == "__main__":
    key = jax.random.PRNGKey(0)
    batch, input_size, hidden_size, num_classes = 8, 32, 32, 16
    num_layers = 1  # unused by the forward pass (matches the PyTorch module)

    kx, kp = jax.random.split(key)
    x = jax.random.normal(kx, (batch, input_size), jnp.float32)
    w1, b1, w2, b2 = init_params(kp, input_size, hidden_size, num_classes)

    # One-time parameter prep (transpose + class-pad + bf16 cast), hoisted out
    # of the forward path.
    w1t, b1_2d, w2t, b2_2d, C = prepare_params(w1, b1, w2, b2)

    out = classification1_forward(x, w1t, b1_2d, w2t, b2_2d, C)
    jax.block_until_ready(out)

    # Reference check in plain JAX (same math as the PyTorch module, f32).
    ref = (x @ w1.T + b1) @ w2.T + b2
    assert out.shape == (batch, num_classes)
    # bf16 operands with f32 accumulation -> relaxed tolerance vs. the f32 ref.
    assert jnp.allclose(out, ref, atol=5e-2, rtol=5e-2)

    print("KERNEL_OK")
</pallas_src>

<mosaic_0001>
module attributes {stable_mosaic.version = 11 : i64} {
  func.func @mlp_kernel(%arg0: i32, %arg1: memref<16x32xbf16, #tpu.memory_space<vmem>>, %arg2: memref<32x32xbf16, #tpu.memory_space<vmem>>, %arg3: memref<1x32xf32, #tpu.memory_space<vmem>>, %arg4: memref<32x128xbf16, #tpu.memory_space<vmem>>, %arg5: memref<1x128xf32, #tpu.memory_space<vmem>>, %arg6: memref<16x128xf32, #tpu.memory_space<vmem>>) attributes {dimension_semantics = [#tpu.dimension_semantics<parallel>], iteration_bounds = array<i64: 1>, scalar_prefetch = 0 : i64, scratch_operands = 0 : i64, tpu.core_type = #tpu.core_type<tc>, window_params = [{transform_indices = @transform_0, window_bounds = array<i64: 16, 32>}, {pipeline_mode = #tpu.pipeline_mode<synchronous>, transform_indices = @transform_1, window_bounds = array<i64: 32, 32>}, {pipeline_mode = #tpu.pipeline_mode<synchronous>, transform_indices = @transform_2, window_bounds = array<i64: 1, 32>}, {pipeline_mode = #tpu.pipeline_mode<synchronous>, transform_indices = @transform_3, window_bounds = array<i64: 32, 128>}, {pipeline_mode = #tpu.pipeline_mode<synchronous>, transform_indices = @transform_4, window_bounds = array<i64: 1, 128>}, {transform_indices = @transform_5, window_bounds = array<i64: 16, 128>}]} {
    %c0 = arith.constant 0 : index
    %c0_0 = arith.constant 0 : index
    %0 = vector.load %arg1[%c0, %c0_0] : memref<16x32xbf16, #tpu.memory_space<vmem>>, vector<16x32xbf16>
    %c0_1 = arith.constant 0 : index
    %c0_2 = arith.constant 0 : index
    %1 = vector.load %arg2[%c0_1, %c0_2] : memref<32x32xbf16, #tpu.memory_space<vmem>>, vector<32x32xbf16>
    %cst = arith.constant dense<0.000000e+00> : vector<16x32xf32>
    %2 = tpu.matmul %0, %1, %cst {dimension_numbers = #tpu.dot_dimension_numbers<[1], [0], [0], [1], [0, 0, 1, 1], [], []>} : vector<16x32xbf16>, vector<32x32xbf16>, vector<16x32xf32> -> vector<16x32xf32>
    %c0_3 = arith.constant 0 : index
    %c0_4 = arith.constant 0 : index
    %3 = vector.load %arg3[%c0_3, %c0_4] : memref<1x32xf32, #tpu.memory_space<vmem>>, vector<1x32xf32>
    %4 = vector.broadcast %3 : vector<1x32xf32> to vector<16x32xf32>
    %5 = arith.addf %2, %4 : vector<16x32xf32>
    %6 = arith.truncf %5 : vector<16x32xf32> to vector<16x32xbf16>
    %c0_5 = arith.constant 0 : index
    %c0_6 = arith.constant 0 : index
    %7 = vector.load %arg4[%c0_5, %c0_6] : memref<32x128xbf16, #tpu.memory_space<vmem>>, vector<32x128xbf16>
    %cst_7 = arith.constant dense<0.000000e+00> : vector<16x128xf32>
    %8 = tpu.matmul %6, %7, %cst_7 {dimension_numbers = #tpu.dot_dimension_numbers<[1], [0], [0], [1], [0, 0, 1, 1], [], []>} : vector<16x32xbf16>, vector<32x128xbf16>, vector<16x128xf32> -> vector<16x128xf32>
    %c0_8 = arith.constant 0 : index
    %c0_9 = arith.constant 0 : index
    %9 = vector.load %arg5[%c0_8, %c0_9] : memref<1x128xf32, #tpu.memory_space<vmem>>, vector<1x128xf32>
    %10 = vector.broadcast %9 : vector<1x128xf32> to vector<16x128xf32>
    %11 = arith.addf %8, %10 : vector<16x128xf32>
    %c0_10 = arith.constant 0 : index
    %c0_11 = arith.constant 0 : index
    %12 = vector.load %arg6[%c0_10, %c0_11] : memref<16x128xf32, #tpu.memory_space<vmem>>, vector<16x128xf32>
    tpu.vector_store %arg6[%c0_10, %c0_11], %11 {strides = array<i32>} : memref<16x128xf32, #tpu.memory_space<vmem>>, vector<16x128xf32>,
    return
  }
  func.func @transform_0(%arg0: i32) -> (i32, i32) {
    %c0_i32 = arith.constant 0 : i32
    %c0_i32_0 = arith.constant 0 : i32
    return %arg0, %c0_i32 : i32, i32
  }
  func.func @transform_1(%arg0: i32) -> (i32, i32) {
    %c0_i32 = arith.constant 0 : i32
    %c0_i32_0 = arith.constant 0 : i32
    %c0_i32_1 = arith.constant 0 : i32
    return %c0_i32, %c0_i32_0 : i32, i32
  }
  func.func @transform_2(%arg0: i32) -> (i32, i32) {
    %c0_i32 = arith.constant 0 : i32
    %c0_i32_0 = arith.constant 0 : i32
    %c0_i32_1 = arith.constant 0 : i32
    return %c0_i32, %c0_i32_0 : i32, i32
  }
  func.func @transform_3(%arg0: i32) -> (i32, i32) {
    %c0_i32 = arith.constant 0 : i32
    %c0_i32_0 = arith.constant 0 : i32
    %c0_i32_1 = arith.constant 0 : i32
    return %c0_i32, %c0_i32_0 : i32, i32
  }
  func.func @transform_4(%arg0: i32) -> (i32, i32) {
    %c0_i32 = arith.constant 0 : i32
    %c0_i32_0 = arith.constant 0 : i32
    %c0_i32_1 = arith.constant 0 : i32
    return %c0_i32, %c0_i32_0 : i32, i32
  }
  func.func @transform_5(%arg0: i32) -> (i32, i32) {
    %c0_i32 = arith.constant 0 : i32
    %c0_i32_0 = arith.constant 0 : i32
    return %arg0, %c0_i32 : i32, i32
  }
}

</mosaic_0001>

<bundles_post_ra>
// kernel: tpu_custom_call.1
= control target key start
LH: loop header
LB: loop body
LE: loop exit
PB: predicated region body
PF: predicated region fallthrough
CT: control target
= control target key end

     0   :  { %10 = vsyncpa [#allocation3], 0  ;;  %s476_s0 = inlined_call_operand.hbm [shape: bf16[16,32], index: 0, kind: input, shape index: {}]   ;;  %s477_s1 = inlined_call_operand.hbm [shape: bf16[32,32], index: 1, kind: input, shape index: {}]   ;;  %s478_s2 = inlined_call_operand.vmem [shape: f32[1,32], index: 2, kind: input, shape index: {}]   ;;  %s479_s3 = inlined_call_operand.hbm [shape: bf16[32,128], index: 3, kind: input, shape index: {}]   ;;  %s480_s4 = inlined_call_operand.vmem [shape: f32[1,128], index: 4, kind: input, shape index: {}]   ;;  %s481_s5 = inlined_call_operand.hbm [shape: f32[16,128], index: 5, kind: output, shape index: {}]  }
   0x1   :  { %11 = vsyncpa [#allocation6], 0 }
   0x2   :  { %12 = vsyncpa [#allocation4], 0  ;;  %s366_s18 = smov [#allocation5]   ;;  %s367_s20 = smov [#allocation2]  }
   0x3   :  { %s30_s19 = sshll.u32 %s366_s18, 4  ;;  %s18_s21 = sshll.u32 %s367_s20, 4  ;;  %s31_s19 = int_to_ptr.vmem [resolvable:$true] %s30_s19  ;;  %s406_s21 = int_to_ptr.vmem [resolvable:$true] %s18_s21 }
   0x4   :  { %s272_s24 = scalar_lea.hbm %s477_s1, 256 }
   0x5   :  { %p273_p0 = scmp.ne.s32.totalorder %s477_s1, %s272_s24  ;;  %p276_p1 = scmp.lt.u32.totalorder %s272_s24, %s477_s1 }
   0x7   :  { %p278_p2 = pnand %p276_p1, %p273_p0 }
   0x9   :  { %281 = shalt.err (!%p278_p2)
}
   0xa   :  { %s282_s29 = scalar_lea.vmem %s31_s19, 256  ;;  %p287_p4 = scmp.lt.s32.totalorder %s31_s19, %s31_s19 }
   0xb   :  { %p283_p3 = scmp.ne.s32.totalorder %s31_s19, %s282_s29  ;;  %p288_p5 = scmp.lt.s32.totalorder %s282_s29, %s282_s29 }
   0xd   :  { %p289_p6 = por %p288_p5, %p287_p4 }
   0xf   :  { %p290_p7 = pnand %p289_p6, %p283_p3 }
  0x11   :  { %293 = shalt.err (!%p290_p7)
}
  0x12   :  { %s368_s30 = smov 64   ;;  %s369_s6 = smov 4  }
  0x13   :  { %36 = dma.hbm_to_vmem [thread:$0]  %s477_s1, 256, %s31_s19, [#allocation6], %s368_s30, %s368_s30, %s369_s6  }
  0x14   :  { %s294_s11 = scalar_lea.hbm %s476_s0, 128 }
  0x15   :  { %p295_p8 = scmp.ne.s32.totalorder %s476_s0, %s294_s11  ;;  %p298_p9 = scmp.lt.u32.totalorder %s294_s11, %s476_s0 }
  0x17   :  { %p300_p10 = pnand %p298_p9, %p295_p8 }
  0x19   :  { %303 = shalt.err (!%p300_p10)
}
  0x1a   :  { %s304_s16 = scalar_lea.vmem %s406_s21, 128  ;;  %p309_p12 = scmp.lt.s32.totalorder %s406_s21, %s406_s21 }
  0x1b   :  { %p305_p11 = scmp.ne.s32.totalorder %s406_s21, %s304_s16  ;;  %p310_p13 = scmp.lt.s32.totalorder %s304_s16, %s304_s16 }
  0x1d   :  { %p311_p0 = por %p310_p13, %p309_p12 }
  0x1f   :  { %p312_p1 = pnand %p311_p0, %p305_p11 }
  0x21   :  { %315 = shalt.err (!%p312_p1)
}
  0x22   :  { %24 = dma.hbm_to_vmem [thread:$0]  %s476_s0, 128, %s406_s21, [#allocation3], %s368_s30, %s368_s30, %s369_s6  }
  0x23   :  { %s370_s18 = smov [#allocation7]   ;;  %s316_s23 = scalar_lea.hbm %s479_s3, 256 }
  0x24   :  { %s44_s19 = sshll.u32 %s370_s18, 4  ;;  %p317_p2 = scmp.ne.s32.totalorder %s479_s3, %s316_s23  ;;  %s45_s19 = int_to_ptr.vmem [resolvable:$true] %s44_s19 }
  0x25   :  { %p320_p3 = scmp.lt.u32.totalorder %s316_s23, %s479_s3 }
  0x27   :  { %p322_p4 = pnand %p320_p3, %p317_p2 }
  0x29   :  { %325 = shalt.err (!%p322_p4)
}
  0x2a   :  { %s326_s28 = scalar_lea.vmem %s45_s19, 256  ;;  %p331_p6 = scmp.lt.s32.totalorder %s45_s19, %s45_s19 }
  0x2b   :  { %p327_p5 = scmp.ne.s32.totalorder %s45_s19, %s326_s28  ;;  %p332_p7 = scmp.lt.s32.totalorder %s326_s28, %s326_s28 }
  0x2d   :  { %p333_p8 = por %p332_p7, %p331_p6 }
  0x2f   :  { %p334_p9 = pnand %p333_p8, %p327_p5 }
  0x31   :  { %337 = shalt.err (!%p334_p9)
}
  0x32   :  { %50 = dma.hbm_to_vmem [thread:$0]  %s479_s3, 256, %s45_s19, [#allocation6], %s368_s30, %s368_s30, %s369_s6  }
  0x33   :  { %360 = dma.done.wait [#allocation3], 128  }
  0x34   :  { %361 = vsyncadd [#allocation3], 4294967168 }
  0x35   :  { %362 = dma.done.wait [#allocation6], 512  }
  0x36   :  { %363 = vsyncadd [#allocation6], 4294966784  ;;  %v371_v0 = vmov 0.0   ;;  %vm372_vm0 = vmmov 0   ;;  %v267_v1 = vld [vmem:[#allocation5] sm:$0xff]   ;;  %v268_v2 = vld [vmem:[#allocation5 + $0x8] sm:$0xff]  }
  0x37   :  { %241 = vmatprep.subr.bf16.mxu0 %v371_v0  ;;  %245 = vmatprep.mubr.msk.bf16.mxu0 %vm372_vm0, %v371_v0  ;;  %v269_v3 = vld [vmem:[#allocation2] sm:$0xff]   ;;  %vm93_vm1 = vcmask 261120   ;;  %v270_v4 = vld [vmem:[#allocation7] sm:$0xff]   ;;  %s373_s7 = smov [#allocation8]  }
  0x38   :  { %249 = vmatprep.subr.bf16.mxu1 %v371_v0  ;;  %253 = vmatprep.mubr.msk.bf16.mxu1 %vm372_vm0, %v371_v0  ;;  %v271_v5 = vld [vmem:[#allocation7 + $0x8] sm:$0xff]   ;;  %s213_s8 = sshll.u32 %s373_s7, 4  ;;  %s214_s8 = int_to_ptr.vmem [resolvable:$true] %s213_s8 }
  0x39   :  { %242 = vmatpush3.bf16.msra.mxu0 %v267_v1  ;;  %250 = vmatpush3.bf16.msra.mxu1 %v270_v4  ;;  %v226_v6 = vld [vmem:[%s478_s2] ss:$0 sm:$0xff]  ;;  %s338_s2 = scalar_lea.vmem %s214_s8, 256  ;;  %p343_p11 = scmp.lt.s32.totalorder %s214_s8, %s214_s8 }
  0x3a   :  { %243 = vmatprep.subr.bf16.mxu0 %v371_v0  ;;  %251 = vmatprep.subr.bf16.mxu1 %v371_v0  ;;  %v231_v14 = vld [vmem:[%s480_s4] ss:$0 sm:$0xff]  ;;  %p339_p10 = scmp.ne.s32.totalorder %s214_s8, %s338_s2  ;;  %p344_p12 = scmp.lt.s32.totalorder %s338_s2, %s338_s2 }
  0x3c   :  { %p345_p13 = por %p344_p12, %p343_p11 }
  0x3d   :  { %244 = vmatpush3.bf16.msra.mxu0 %v268_v2  ;;  %252 = vmatpush3.bf16.msra.mxu1 %v271_v5 }
  0x3e   :  { %p346_p0 = pnand %p345_p13, %p339_p10 }
  0x40   :  { %246 = vmatmul.mubr.msk.bf16.vlgmr.msra.gmra.mrb[0].mxu0 %vm93_vm1, %v269_v3 }
 0x113   :  { %v131_v7 = vpop.f32.mrb[0].mxu0 }
 0x114   :  { %v247_v8 = vpop.f32.mrb[1].mxu0  ;;  %v132_v10 = vadd.f32 %v226_v6, %v131_v7 }
 0x115   :  { %v134_v9 = vpop.f32.mrb[2].mxu0 }
 0x116   :  { %v135_v11 = vadd.f32 %v226_v6, %v134_v9  ;;  %v248_v12 = vpop.f32.mrb[3].mxu0 }
 0x118   :  { %v138_v13 = vpack.c.bf16 %v135_v11, %v132_v10 }
 0x11a   :  { %254 = vmatmul.mubr.msk.bf16.vlgmr.msra.gmra.mrb[0].mxu1 %vm93_vm1, %v138_v13 }
 0x1ed   :  { %v199_v15 = vpop.f32.mrb[0].mxu1 }
 0x1ee   :  { %v200_v16 = vadd.f32 %v231_v14, %v199_v15  ;;  %v255_v17 = vpop.f32.mrb[1].mxu1 }
 0x1ef   :  { %v202_v18 = vpop.f32.mrb[2].mxu1 }
 0x1f0   :  { %206 = vst [vmem:[#allocation8] sm:$0xff] %v200_v16  ;;  %v203_v19 = vadd.f32 %v231_v14, %v202_v18  ;;  %v256_v20 = vpop.f32.mrb[3].mxu1 }
 0x1f2   :  { %207 = vst [vmem:[#allocation8 + $0x8] sm:$0xff] %v203_v19 }
 0x1f3   :  { %349 = shalt.err (!%p346_p0)
}
 0x1f4   :  { %s350_s10 = scalar_lea.hbm %s481_s5, 256 }
 0x1f5   :  { %p351_p1 = scmp.ne.s32.totalorder %s481_s5, %s350_s10  ;;  %p354_p2 = scmp.lt.u32.totalorder %s350_s10, %s481_s5 }
 0x1f7   :  { %p356_p3 = pnand %p354_p2, %p351_p1 }
 0x1f9   :  { %359 = shalt.err (!%p356_p3)
}
 0x1fa   :  { %s374_s15 = smov 128   ;;  %s375_s16 = smov 8  }
 0x1fb   :  { %219 = dma.vmem_to_hbm [thread:$0]  %s214_s8, 256, %s481_s5, [#allocation4], %s374_s15, %s374_s15, %s375_s16  }
 0x1fc   :  { %364 = dma.done.wait [#allocation4], 256  }
 0x1fd   :  { %365 = vsyncadd [#allocation4], 4294967040 }
 0x1fe   :  { %223 = vsyncpa [#allocation3], 1 }
 0x1ff   :  { %224 = vsyncpa [#allocation6], 1 }
 0x200   :  { %225 = vsyncpa [#allocation4], 1 }

</bundles_post_ra>
